<compile_context>
chip_gen: v7x
topology: tpu7x:2x2x1
jax: 0.10.0
libtpu: 0.0.40
codegen_flags: <defaults>
</compile_context>

<pallas_src>
import math
import numpy as np
import jax
import jax.numpy as jnp
from jax import lax
from jax.experimental import pallas as pl
from jax.experimental.pallas import tpu as pltpu


def _round_up(x, m):
    return (x + m - 1) // m * m


def _vmem_limit_bytes():
    """Generation-aware VMEM budget (leave headroom for compiler scratch)."""
    try:
        cap = pltpu.get_tpu_info().vmem_capacity_bytes
    except Exception:
        cap = 64 * 1024 * 1024  # conservative (v7x-sized) fallback
    return max(32 * 1024 * 1024, min(int(cap) * 3 // 4, 100 * 1024 * 1024))


def make_layer_kernel(num_nodes, tile_n, tile_e, f_in, f_out, apply_tanh):
    """One GNN layer, feature-major, grid = (node_splits, edge_tiles)."""

    def kernel(hg_ref, hn_ref, src_ref, dst_ref,
               wuu_ref, buu_ref, wuv_ref, buv_ref, out_ref):
        et = pl.program_id(1)                       # edge tile ("arbitrary" reduction)
        n_off = pl.program_id(0) * tile_n           # node slice ("parallel")

        # ---- once per node slice: init accumulator with self-loop + B_uu ----
        @pl.when(et == 0)
        def _init():
            hn = hn_ref[...]                                    # (f_in, tile_n) f32
            wuu = wuu_ref[...].astype(jnp.float32)              # (f_in*f_out, tile_n)
            acc = buu_ref[...]                                  # (f_out, tile_n) f32
            for i in range(f_in):                               # sublane-row broadcasts
                acc = acc + hn[i:i + 1, :] * wuu[i * f_out:(i + 1) * f_out, :]
            out_ref[...] = acc

        # ---- gather source-node features for this edge tile (MXU, bf16) ----
        src_row = src_ref[...]                                  # (1, tile_e) int32
        node_ids = lax.broadcasted_iota(jnp.int32, (num_nodes, tile_e), 0)
        sel_src_t = (node_ids == src_row).astype(jnp.bfloat16)  # (N, tile_e) one-hot
        src_h = jnp.dot(hg_ref[...], sel_src_t,
                        preferred_element_type=jnp.float32)     # (f_in, tile_e) f32

        # ---- per-edge messages: lane-dense VPU FMAs over packed W_uv ----
        wuv = wuv_ref[...].astype(jnp.float32)                  # (f_in*f_out, tile_e)
        msg = buv_ref[...]                                      # (f_out, tile_e) f32
        for i in range(f_in):
            msg = msg + src_h[i:i + 1, :] * wuv[i * f_out:(i + 1) * f_out, :]

        # ---- scatter-sum into this node slice (MXU, contract edge axis) ----
        dst_row = dst_ref[...]                                  # (1, tile_e) int32
        node_rows = lax.broadcasted_iota(jnp.int32, (tile_n, tile_e), 0) + n_off
        sel_dst = (node_rows == dst_row).astype(jnp.bfloat16)   # (tile_n, tile_e)
        out_ref[...] += lax.dot_general(
            msg.astype(jnp.bfloat16), sel_dst,
            (((1,), (1,)), ((), ())),                           # msg @ sel_dst^T
            preferred_element_type=jnp.float32)                 # (f_out, tile_n)

        if apply_tanh:
            @pl.when(et == pl.num_programs(1) - 1)
            def _finish():
                out_ref[...] = jnp.tanh(out_ref[...])

    return kernel


def gnn_layer_forward(h_fm, src_row, dst_row, packed, *, tile_e,
                      node_splits=1, apply_tanh=False):
    """h_fm: feature-major node features (f_in, N) f32. Returns (f_out, N) f32."""
    f_in, num_nodes = h_fm.shape
    wuv, wuu, buv, buu = packed["Wuv"], packed["Wuu"], packed["Buv"], packed["Buu"]
    f_out = buu.shape[0]
    e_pad = wuv.shape[1]
    assert wuv.shape == (f_in * f_out, e_pad)
    assert wuu.shape == (f_in * f_out, num_nodes)
    assert buv.shape == (f_out, e_pad) and buu.shape == (f_out, num_nodes)
    assert src_row.shape == (1, e_pad) and dst_row.shape == (1, e_pad)
    assert tile_e % 128 == 0 and e_pad % tile_e == 0
    assert num_nodes % node_splits == 0
    tile_n = num_nodes // node_splits
    assert node_splits == 1 or tile_n % 128 == 0
    n_et = e_pad // tile_e

    kernel = make_layer_kernel(num_nodes, tile_n, tile_e, f_in, f_out, apply_tanh)
    h_gather = h_fm.astype(jnp.bfloat16)   # exact 0/1 selection of bf16(h) on the MXU

    in_arrays = (h_gather, h_fm, src_row, dst_row, wuu, buu, wuv, buv)

    # Cost hint: edge-blocked streams are read once per node split; node data once.
    edge_bytes = wuv.size * 2 + buv.size * 4 + src_row.size * 4 + dst_row.size * 4
    node_bytes = (wuu.size * 2 + buu.size * 4 + h_gather.size * 2 + h_fm.size * 4
                  + num_nodes * f_out * 4)
    flops = int(node_splits * e_pad * (2 * f_in * num_nodes + 2 * f_in * f_out)
                + 2 * f_out * e_pad * num_nodes
                + 2 * num_nodes * f_in * f_out)
    cost = pl.CostEstimate(
        flops=flops,
        transcendentals=num_nodes * f_out if apply_tanh else 0,
        bytes_accessed=int(node_splits * edge_bytes + node_bytes))

    grid_spec = pltpu.PrefetchScalarGridSpec(
        num_scalar_prefetch=0,
        grid=(node_splits, n_et),
        in_specs=[
            # full node features (bf16), resident: gather operand
            pl.BlockSpec((f_in, num_nodes), lambda n, e: (0, 0)),
            # this node slice's features (f32): self-loop term
            pl.BlockSpec((f_in, tile_n), lambda n, e: (0, n)),
            # streamed, lane-dense edge indices
            pl.BlockSpec((1, tile_e), lambda n, e: (0, e)),             # src
            pl.BlockSpec((1, tile_e), lambda n, e: (0, e)),             # dst
            # per-node params (constant along the edge axis)
            pl.BlockSpec((f_in * f_out, tile_n), lambda n, e: (0, n)),  # W_uu (bf16)
            pl.BlockSpec((f_out, tile_n), lambda n, e: (0, n)),         # B_uu (f32)
            # per-edge params, streamed / double-buffered along E
            pl.BlockSpec((f_in * f_out, tile_e), lambda n, e: (0, e)),  # W_uv (bf16)
            pl.BlockSpec((f_out, tile_e), lambda n, e: (0, e)),         # B_uv (f32)
        ],
        out_specs=pl.BlockSpec((f_out, tile_n), lambda n, e: (0, n)),
    )

    return pl.pallas_call(
        kernel,
        out_shape=jax.ShapeDtypeStruct((f_out, num_nodes), jnp.float32),
        grid_spec=grid_spec,
        compiler_params=pltpu.CompilerParams(
            dimension_semantics=("parallel", "arbitrary"),
            vmem_limit_bytes=_vmem_limit_bytes()),
        cost_estimate=cost,
    )(*in_arrays)


def pack_edges(src, dst, tile_e):
    """Pad edge lists to a multiple of tile_e; padded edges scatter nowhere (dst=-1)."""
    src = np.asarray(src, np.int32)
    dst = np.asarray(dst, np.int32)
    e = src.shape[0]
    e_pad = max(tile_e, _round_up(e, tile_e))
    src_p = np.zeros(e_pad, np.int32)
    src_p[:e] = src
    dst_p = np.full(e_pad, -1, np.int32)
    dst_p[:e] = dst
    return (jnp.asarray(src_p).reshape(1, e_pad),
            jnp.asarray(dst_p).reshape(1, e_pad), e_pad)


def pack_layer_params(p, e_pad):
    """Module-layout (E,in,out)/(N,in,out) params -> feature-major kernel layout."""
    e, f_in, f_out = p["Wuv3"].shape
    n = p["Wuu3"].shape[0]
    wuv = jnp.transpose(p["Wuv3"], (1, 2, 0)).reshape(f_in * f_out, e)
    wuv = jnp.pad(wuv, ((0, 0), (0, e_pad - e))).astype(jnp.bfloat16)
    wuu = jnp.transpose(p["Wuu3"], (1, 2, 0)).reshape(f_in * f_out, n).astype(jnp.bfloat16)
    buv = jnp.pad(p["Buv"].T, ((0, 0), (0, e_pad - e))).astype(jnp.float32)
    buu = p["Buu"].T.astype(jnp.float32)
    return dict(Wuv=wuv, Wuu=wuu, Buv=buv, Buu=buu)


def gnn_forward(feat, src, dst, params1, params2, *, tile_e=256, node_splits=1):
    """feat: (N, in_feat) f32 -> (N, out_feat) f32, matching GNN.forward."""
    src_row, dst_row, e_pad = pack_edges(src, dst, tile_e)
    p1 = pack_layer_params(params1, e_pad)
    p2 = pack_layer_params(params2, e_pad)
    h0 = feat.T                                   # feature-major (f_in, N)
    h1 = gnn_layer_forward(h0, src_row, dst_row, p1, tile_e=tile_e,
                           node_splits=node_splits, apply_tanh=True)
    out_fm = gnn_layer_forward(h1, src_row, dst_row, p2, tile_e=tile_e,
                               node_splits=node_splits, apply_tanh=False)
    return out_fm.T                               # back to (N, f_out)


def init_layer_params(key, num_nodes, num_edges, in_feat, out_feat):
    """Mirrors GNN_Layer._reset_parameters (module layout, f32)."""
    k1, k2 = jax.random.split(key)
    b_uv = 1.0 / math.sqrt(in_feat)
    wuv3 = jax.random.uniform(k1, (num_edges, in_feat, out_feat),
                              jnp.float32, -b_uv, b_uv)
    gain = 5.0 / 3.0                              # nn.init.calculate_gain('tanh')
    fan_in = in_feat * out_feat                   # PyTorch fan rule for 3-D tensors
    fan_out = num_nodes * out_feat
    b_uu = gain * math.sqrt(6.0 / (fan_in + fan_out))
    wuu3 = jax.random.uniform(k2, (num_nodes, in_feat, out_feat),
                              jnp.float32, -b_uu, b_uu)
    return dict(Wuv3=wuv3, Wuu3=wuu3,
                Buv=jnp.zeros((num_edges, out_feat), jnp.float32),
                Buu=jnp.zeros((num_nodes, out_feat), jnp.float32))


if __name__ == "__main__":
    # small synthetic graph + features (hidden=8 is fixed by the module)
    num_nodes, num_edges = 128, 512
    in_feat, hidden, out_feat = 8, 8, 4
    tile_e = 256

    key = jax.random.PRNGKey(0)
    kf, k1, k2, kb1, kb2, kb3, kb4 = jax.random.split(key, 7)
    feat = jax.random.normal(kf, (num_nodes, in_feat), jnp.float32)

    # deterministic edge list
    eidx = np.arange(num_edges)
    src = (eidx % num_nodes).astype(np.int32)
    dst = ((7 * eidx + 3) % num_nodes).astype(np.int32)

    p1 = init_layer_params(k1, num_nodes, num_edges, in_feat, hidden)
    p2 = init_layer_params(k2, num_nodes, num_edges, hidden, out_feat)
    # The module initializes biases to zero; use non-zero values so the test
    # exercises the B_uu / B_uv paths in the kernel.
    p1["Buu"] = 0.1 * jax.random.normal(kb1, (num_nodes, hidden), jnp.float32)
    p1["Buv"] = 0.1 * jax.random.normal(kb2, (num_edges, hidden), jnp.float32)
    p2["Buu"] = 0.1 * jax.random.normal(kb3, (num_nodes, out_feat), jnp.float32)
    p2["Buv"] = 0.1 * jax.random.normal(kb4, (num_edges, out_feat), jnp.float32)

    out = jax.block_until_ready(
        gnn_forward(feat, src, dst, p1, p2, tile_e=tile_e, node_splits=1))

    # pure-JAX reference: module math with the kernel's documented bf16
    # quantization of weights / gathered features / scattered messages.
    def ref_layer(h, p):
        wuv3 = p["Wuv3"].astype(jnp.bfloat16).astype(jnp.float32)
        wuu3 = p["Wuu3"].astype(jnp.bfloat16).astype(jnp.float32)
        loop = jnp.einsum('ni,nio->no', h, wuu3)
        hs = h[src].astype(jnp.bfloat16).astype(jnp.float32)
        m = jnp.einsum('ei,eio->eo', hs, wuv3) + p["Buv"]
        m = m.astype(jnp.bfloat16).astype(jnp.float32)
        agg = jnp.zeros((h.shape[0], wuv3.shape[2]), jnp.float32).at[dst].add(m)
        return agg + p["Buu"] + loop

    ref = ref_layer(jnp.tanh(ref_layer(feat, p1)), p2)

    assert out.shape == (num_nodes, out_feat)
    err = float(jnp.max(jnp.abs(out - ref)))
    assert jnp.allclose(out, ref, atol=5e-3, rtol=5e-3), f"mismatch, max err {err}"
    print("KERNEL_OK")
</pallas_src>

<mosaic_0001>
module attributes {stable_mosaic.version = 11 : i64} {
  func.func @kernel(%arg0: i32, %arg1: i32, %arg2: memref<8x128xbf16, #tpu.memory_space<vmem>>, %arg3: memref<8x128xf32, #tpu.memory_space<vmem>>, %arg4: memref<1x256xi32, #tpu.memory_space<vmem>>, %arg5: memref<1x256xi32, #tpu.memory_space<vmem>>, %arg6: memref<64x128xbf16, #tpu.memory_space<vmem>>, %arg7: memref<8x128xf32, #tpu.memory_space<vmem>>, %arg8: memref<64x256xbf16, #tpu.memory_space<vmem>>, %arg9: memref<8x256xf32, #tpu.memory_space<vmem>>, %arg10: memref<8x128xf32, #tpu.memory_space<vmem>>) attributes {dimension_semantics = [#tpu.dimension_semantics<parallel>, #tpu.dimension_semantics<arbitrary>], iteration_bounds = array<i64: 1, 2>, scalar_prefetch = 0 : i64, scratch_operands = 0 : i64, tpu.core_type = #tpu.core_type<tc>, window_params = [{pipeline_mode = #tpu.pipeline_mode<synchronous>, transform_indices = @transform_0, window_bounds = array<i64: 8, 128>}, {transform_indices = @transform_1, window_bounds = array<i64: 8, 128>}, {transform_indices = @transform_2, window_bounds = array<i64: 1, 256>}, {transform_indices = @transform_3, window_bounds = array<i64: 1, 256>}, {transform_indices = @transform_4, window_bounds = array<i64: 64, 128>}, {transform_indices = @transform_5, window_bounds = array<i64: 8, 128>}, {transform_indices = @transform_6, window_bounds = array<i64: 64, 256>}, {transform_indices = @transform_7, window_bounds = array<i64: 8, 256>}, {transform_indices = @transform_8, window_bounds = array<i64: 8, 128>}]} {
    %c128_i32 = arith.constant 128 : i32
    %0 = arith.muli %arg0, %c128_i32 : i32
    %c0_i32 = arith.constant 0 : i32
    %1 = arith.cmpi eq, %arg1, %c0_i32 : i32
    %2 = arith.extui %1 : i1 to i32
    %c0_i32_0 = arith.constant 0 : i32
    %3 = arith.cmpi ne, %2, %c0_i32_0 : i32
    scf.if %3 {
      %c0_16 = arith.constant 0 : index
      %c0_17 = arith.constant 0 : index
      %73 = vector.load %arg3[%c0_16, %c0_17] : memref<8x128xf32, #tpu.memory_space<vmem>>, vector<8x128xf32>
      %c0_18 = arith.constant 0 : index
      %c0_19 = arith.constant 0 : index
      %74 = vector.load %arg6[%c0_18, %c0_19] : memref<64x128xbf16, #tpu.memory_space<vmem>>, vector<64x128xbf16>
      %75 = arith.extf %74 : vector<64x128xbf16> to vector<64x128xf32>
      %c0_20 = arith.constant 0 : index
      %c0_21 = arith.constant 0 : index
      %76 = vector.load %arg7[%c0_20, %c0_21] : memref<8x128xf32, #tpu.memory_space<vmem>>, vector<8x128xf32>
      %77 = vector.extract_strided_slice %73 {offsets = [0, 0], sizes = [1, 128], strides = [1, 1]} : vector<8x128xf32> to vector<1x128xf32>
      %78 = vector.extract_strided_slice %75 {offsets = [0, 0], sizes = [8, 128], strides = [1, 1]} : vector<64x128xf32> to vector<8x128xf32>
      %79 = vector.broadcast %77 : vector<1x128xf32> to vector<8x128xf32>
      %80 = arith.mulf %79, %78 : vector<8x128xf32>
      %81 = arith.addf %76, %80 : vector<8x128xf32>
      %82 = vector.extract_strided_slice %73 {offsets = [1, 0], sizes = [1, 128], strides = [1, 1]} : vector<8x128xf32> to vector<1x128xf32>
      %83 = vector.extract_strided_slice %75 {offsets = [8, 0], sizes = [8, 128], strides = [1, 1]} : vector<64x128xf32> to vector<8x128xf32>
      %84 = vector.broadcast %82 : vector<1x128xf32> to vector<8x128xf32>
      %85 = arith.mulf %84, %83 : vector<8x128xf32>
      %86 = arith.addf %81, %85 : vector<8x128xf32>
      %87 = vector.extract_strided_slice %73 {offsets = [2, 0], sizes = [1, 128], strides = [1, 1]} : vector<8x128xf32> to vector<1x128xf32>
      %88 = vector.extract_strided_slice %75 {offsets = [16, 0], sizes = [8, 128], strides = [1, 1]} : vector<64x128xf32> to vector<8x128xf32>
      %89 = vector.broadcast %87 : vector<1x128xf32> to vector<8x128xf32>
      %90 = arith.mulf %89, %88 : vector<8x128xf32>
      %91 = arith.addf %86, %90 : vector<8x128xf32>
      %92 = vector.extract_strided_slice %73 {offsets = [3, 0], sizes = [1, 128], strides = [1, 1]} : vector<8x128xf32> to vector<1x128xf32>
      %93 = vector.extract_strided_slice %75 {offsets = [24, 0], sizes = [8, 128], strides = [1, 1]} : vector<64x128xf32> to vector<8x128xf32>
      %94 = vector.broadcast %92 : vector<1x128xf32> to vector<8x128xf32>
      %95 = arith.mulf %94, %93 : vector<8x128xf32>
      %96 = arith.addf %91, %95 : vector<8x128xf32>
      %97 = vector.extract_strided_slice %73 {offsets = [4, 0], sizes = [1, 128], strides = [1, 1]} : vector<8x128xf32> to vector<1x128xf32>
      %98 = vector.extract_strided_slice %75 {offsets = [32, 0], sizes = [8, 128], strides = [1, 1]} : vector<64x128xf32> to vector<8x128xf32>
      %99 = vector.broadcast %97 : vector<1x128xf32> to vector<8x128xf32>
      %100 = arith.mulf %99, %98 : vector<8x128xf32>
      %101 = arith.addf %96, %100 : vector<8x128xf32>
      %102 = vector.extract_strided_slice %73 {offsets = [5, 0], sizes = [1, 128], strides = [1, 1]} : vector<8x128xf32> to vector<1x128xf32>
      %103 = vector.extract_strided_slice %75 {offsets = [40, 0], sizes = [8, 128], strides = [1, 1]} : vector<64x128xf32> to vector<8x128xf32>
      %104 = vector.broadcast %102 : vector<1x128xf32> to vector<8x128xf32>
      %105 = arith.mulf %104, %103 : vector<8x128xf32>
      %106 = arith.addf %101, %105 : vector<8x128xf32>
      %107 = vector.extract_strided_slice %73 {offsets = [6, 0], sizes = [1, 128], strides = [1, 1]} : vector<8x128xf32> to vector<1x128xf32>
      %108 = vector.extract_strided_slice %75 {offsets = [48, 0], sizes = [8, 128], strides = [1, 1]} : vector<64x128xf32> to vector<8x128xf32>
      %109 = vector.broadcast %107 : vector<1x128xf32> to vector<8x128xf32>
      %110 = arith.mulf %109, %108 : vector<8x128xf32>
      %111 = arith.addf %106, %110 : vector<8x128xf32>
      %112 = vector.extract_strided_slice %73 {offsets = [7, 0], sizes = [1, 128], strides = [1, 1]} : vector<8x128xf32> to vector<1x128xf32>
      %113 = vector.extract_strided_slice %75 {offsets = [56, 0], sizes = [8, 128], strides = [1, 1]} : vector<64x128xf32> to vector<8x128xf32>
      %114 = vector.broadcast %112 : vector<1x128xf32> to vector<8x128xf32>
      %115 = arith.mulf %114, %113 : vector<8x128xf32>
      %116 = arith.addf %111, %115 : vector<8x128xf32>
      %c0_22 = arith.constant 0 : index
      %c0_23 = arith.constant 0 : index
      %117 = vector.load %arg10[%c0_22, %c0_23] : memref<8x128xf32, #tpu.memory_space<vmem>>, vector<8x128xf32>
      tpu.vector_store %arg10[%c0_22, %c0_23], %116 {strides = array<i32>} : memref<8x128xf32, #tpu.memory_space<vmem>>, vector<8x128xf32>,
    } else {
    }
    %c0 = arith.constant 0 : index
    %c0_1 = arith.constant 0 : index
    %4 = vector.load %arg4[%c0, %c0_1] : memref<1x256xi32, #tpu.memory_space<vmem>>, vector<1x256xi32>
    %5 = tpu.iota {dimensions = array<i32: 0>} : vector<128x256xi32>
    %6 = vector.broadcast %4 : vector<1x256xi32> to vector<128x256xi32>
    %7 = arith.cmpi eq, %5, %6 : vector<128x256xi32>
    %8 = arith.extui %7 : vector<128x256xi1> to vector<128x256xi32>
    %9 = arith.sitofp %8 : vector<128x256xi32> to vector<128x256xf32>
    %10 = arith.truncf %9 : vector<128x256xf32> to vector<128x256xbf16>
    %c0_2 = arith.constant 0 : index
    %c0_3 = arith.constant 0 : index
    %11 = vector.load %arg2[%c0_2, %c0_3] : memref<8x128xbf16, #tpu.memory_space<vmem>>, vector<8x128xbf16>
    %cst = arith.constant dense<0.000000e+00> : vector<8x256xf32>
    %12 = tpu.matmul %11, %10, %cst {dimension_numbers = #tpu.dot_dimension_numbers<[1], [0], [0], [1], [0, 0, 1, 1], [], []>} : vector<8x128xbf16>, vector<128x256xbf16>, vector<8x256xf32> -> vector<8x256xf32>
    %c0_4 = arith.constant 0 : index
    %c0_5 = arith.constant 0 : index
    %13 = vector.load %arg8[%c0_4, %c0_5] : memref<64x256xbf16, #tpu.memory_space<vmem>>, vector<64x256xbf16>
    %14 = arith.extf %13 : vector<64x256xbf16> to vector<64x256xf32>
    %c0_6 = arith.constant 0 : index
    %c0_7 = arith.constant 0 : index
    %15 = vector.load %arg9[%c0_6, %c0_7] : memref<8x256xf32, #tpu.memory_space<vmem>>, vector<8x256xf32>
    %16 = vector.extract_strided_slice %12 {offsets = [0, 0], sizes = [1, 256], strides = [1, 1]} : vector<8x256xf32> to vector<1x256xf32>
    %17 = vector.extract_strided_slice %14 {offsets = [0, 0], sizes = [8, 256], strides = [1, 1]} : vector<64x256xf32> to vector<8x256xf32>
    %18 = vector.broadcast %16 : vector<1x256xf32> to vector<8x256xf32>
    %19 = arith.mulf %18, %17 : vector<8x256xf32>
    %20 = arith.addf %15, %19 : vector<8x256xf32>
    %21 = vector.extract_strided_slice %12 {offsets = [1, 0], sizes = [1, 256], strides = [1, 1]} : vector<8x256xf32> to vector<1x256xf32>
    %22 = vector.extract_strided_slice %14 {offsets = [8, 0], sizes = [8, 256], strides = [1, 1]} : vector<64x256xf32> to vector<8x256xf32>
    %23 = vector.broadcast %21 : vector<1x256xf32> to vector<8x256xf32>
    %24 = arith.mulf %23, %22 : vector<8x256xf32>
    %25 = arith.addf %20, %24 : vector<8x256xf32>
    %26 = vector.extract_strided_slice %12 {offsets = [2, 0], sizes = [1, 256], strides = [1, 1]} : vector<8x256xf32> to vector<1x256xf32>
    %27 = vector.extract_strided_slice %14 {offsets = [16, 0], sizes = [8, 256], strides = [1, 1]} : vector<64x256xf32> to vector<8x256xf32>
    %28 = vector.broadcast %26 : vector<1x256xf32> to vector<8x256xf32>
    %29 = arith.mulf %28, %27 : vector<8x256xf32>
    %30 = arith.addf %25, %29 : vector<8x256xf32>
    %31 = vector.extract_strided_slice %12 {offsets = [3, 0], sizes = [1, 256], strides = [1, 1]} : vector<8x256xf32> to vector<1x256xf32>
    %32 = vector.extract_strided_slice %14 {offsets = [24, 0], sizes = [8, 256], strides = [1, 1]} : vector<64x256xf32> to vector<8x256xf32>
    %33 = vector.broadcast %31 : vector<1x256xf32> to vector<8x256xf32>
    %34 = arith.mulf %33, %32 : vector<8x256xf32>
    %35 = arith.addf %30, %34 : vector<8x256xf32>
    %36 = vector.extract_strided_slice %12 {offsets = [4, 0], sizes = [1, 256], strides = [1, 1]} : vector<8x256xf32> to vector<1x256xf32>
    %37 = vector.extract_strided_slice %14 {offsets = [32, 0], sizes = [8, 256], strides = [1, 1]} : vector<64x256xf32> to vector<8x256xf32>
    %38 = vector.broadcast %36 : vector<1x256xf32> to vector<8x256xf32>
    %39 = arith.mulf %38, %37 : vector<8x256xf32>
    %40 = arith.addf %35, %39 : vector<8x256xf32>
    %41 = vector.extract_strided_slice %12 {offsets = [5, 0], sizes = [1, 256], strides = [1, 1]} : vector<8x256xf32> to vector<1x256xf32>
    %42 = vector.extract_strided_slice %14 {offsets = [40, 0], sizes = [8, 256], strides = [1, 1]} : vector<64x256xf32> to vector<8x256xf32>
    %43 = vector.broadcast %41 : vector<1x256xf32> to vector<8x256xf32>
    %44 = arith.mulf %43, %42 : vector<8x256xf32>
    %45 = arith.addf %40, %44 : vector<8x256xf32>
    %46 = vector.extract_strided_slice %12 {offsets = [6, 0], sizes = [1, 256], strides = [1, 1]} : vector<8x256xf32> to vector<1x256xf32>
    %47 = vector.extract_strided_slice %14 {offsets = [48, 0], sizes = [8, 256], strides = [1, 1]} : vector<64x256xf32> to vector<8x256xf32>
    %48 = vector.broadcast %46 : vector<1x256xf32> to vector<8x256xf32>
    %49 = arith.mulf %48, %47 : vector<8x256xf32>
    %50 = arith.addf %45, %49 : vector<8x256xf32>
    %51 = vector.extract_strided_slice %12 {offsets = [7, 0], sizes = [1, 256], strides = [1, 1]} : vector<8x256xf32> to vector<1x256xf32>
    %52 = vector.extract_strided_slice %14 {offsets = [56, 0], sizes = [8, 256], strides = [1, 1]} : vector<64x256xf32> to vector<8x256xf32>
    %53 = vector.broadcast %51 : vector<1x256xf32> to vector<8x256xf32>
    %54 = arith.mulf %53, %52 : vector<8x256xf32>
    %55 = arith.addf %50, %54 : vector<8x256xf32>
    %c0_8 = arith.constant 0 : index
    %c0_9 = arith.constant 0 : index
    %56 = vector.load %arg5[%c0_8, %c0_9] : memref<1x256xi32, #tpu.memory_space<vmem>>, vector<1x256xi32>
    %57 = tpu.iota {dimensions = array<i32: 0>} : vector<128x256xi32>
    %58 = vector.broadcast %0 : i32 to vector<128x256xi32>
    %59 = arith.addi %57, %58 : vector<128x256xi32>
    %60 = vector.broadcast %56 : vector<1x256xi32> to vector<128x256xi32>
    %61 = arith.cmpi eq, %59, %60 : vector<128x256xi32>
    %62 = arith.extui %61 : vector<128x256xi1> to vector<128x256xi32>
    %63 = arith.sitofp %62 : vector<128x256xi32> to vector<128x256xf32>
    %64 = arith.truncf %63 : vector<128x256xf32> to vector<128x256xbf16>
    %c0_10 = arith.constant 0 : index
    %c0_11 = arith.constant 0 : index
    %65 = vector.load %arg10[%c0_10, %c0_11] : memref<8x128xf32, #tpu.memory_space<vmem>>, vector<8x128xf32>
    %66 = arith.truncf %55 : vector<8x256xf32> to vector<8x256xbf16>
    %cst_12 = arith.constant dense<0.000000e+00> : vector<8x128xf32>
    %67 = tpu.matmul %66, %64, %cst_12 {dimension_numbers = #tpu.dot_dimension_numbers<[1], [1], [0], [0], [0, 0, 1, 0], [], []>} : vector<8x256xbf16>, vector<128x256xbf16>, vector<8x128xf32> -> vector<8x128xf32>
    %68 = arith.addf %65, %67 : vector<8x128xf32>
    %c0_13 = arith.constant 0 : index
    %c0_14 = arith.constant 0 : index
    %69 = vector.load %arg10[%c0_13, %c0_14] : memref<8x128xf32, #tpu.memory_space<vmem>>, vector<8x128xf32>
    tpu.vector_store %arg10[%c0_13, %c0_14], %68 {strides = array<i32>} : memref<8x128xf32, #tpu.memory_space<vmem>>, vector<8x128xf32>,
    %c1_i32 = arith.constant 1 : i32
    %70 = arith.cmpi eq, %arg1, %c1_i32 : i32
    %71 = arith.extui %70 : i1 to i32
    %c0_i32_15 = arith.constant 0 : i32
    %72 = arith.cmpi ne, %71, %c0_i32_15 : i32
    scf.if %72 {
      %c0_16 = arith.constant 0 : index
      %c0_17 = arith.constant 0 : index
      %73 = vector.load %arg10[%c0_16, %c0_17] : memref<8x128xf32, #tpu.memory_space<vmem>>, vector<8x128xf32>
      %74 = math.tanh %73 : vector<8x128xf32>
      %c0_18 = arith.constant 0 : index
      %c0_19 = arith.constant 0 : index
      %75 = vector.load %arg10[%c0_18, %c0_19] : memref<8x128xf32, #tpu.memory_space<vmem>>, vector<8x128xf32>
      tpu.vector_store %arg10[%c0_18, %c0_19], %74 {strides = array<i32>} : memref<8x128xf32, #tpu.memory_space<vmem>>, vector<8x128xf32>,
    } else {
    }
    return
  }
  func.func @transform_0(%arg0: i32, %arg1: i32) -> (i32, i32) {
    %c0_i32 = arith.constant 0 : i32
    %c0_i32_0 = arith.constant 0 : i32
    %c0_i32_1 = arith.constant 0 : i32
    return %c0_i32, %c0_i32_0 : i32, i32
  }
  func.func @transform_1(%arg0: i32, %arg1: i32) -> (i32, i32) {
    %c0_i32 = arith.constant 0 : i32
    %c0_i32_0 = arith.constant 0 : i32
    return %c0_i32, %arg0 : i32, i32
  }
  func.func @transform_2(%arg0: i32, %arg1: i32) -> (i32, i32) {
    %c0_i32 = arith.constant 0 : i32
    %c0_i32_0 = arith.constant 0 : i32
    return %c0_i32, %arg1 : i32, i32
  }
  func.func @transform_3(%arg0: i32, %arg1: i32) -> (i32, i32) {
    %c0_i32 = arith.constant 0 : i32
    %c0_i32_0 = arith.constant 0 : i32
    return %c0_i32, %arg1 : i32, i32
  }
  func.func @transform_4(%arg0: i32, %arg1: i32) -> (i32, i32) {
    %c0_i32 = arith.constant 0 : i32
    %c0_i32_0 = arith.constant 0 : i32
    return %c0_i32, %arg0 : i32, i32
  }
  func.func @transform_5(%arg0: i32, %arg1: i32) -> (i32, i32) {
    %c0_i32 = arith.constant 0 : i32
    %c0_i32_0 = arith.constant 0 : i32
    return %c0_i32, %arg0 : i32, i32
  }
  func.func @transform_6(%arg0: i32, %arg1: i32) -> (i32, i32) {
    %c0_i32 = arith.constant 0 : i32
    %c0_i32_0 = arith.constant 0 : i32
    return %c0_i32, %arg1 : i32, i32
  }
  func.func @transform_7(%arg0: i32, %arg1: i32) -> (i32, i32) {
    %c0_i32 = arith.constant 0 : i32
    %c0_i32_0 = arith.constant 0 : i32
    return %c0_i32, %arg1 : i32, i32
  }
  func.func @transform_8(%arg0: i32, %arg1: i32) -> (i32, i32) {
    %c0_i32 = arith.constant 0 : i32
    %c0_i32_0 = arith.constant 0 : i32
    return %c0_i32, %arg0 : i32, i32
  }
}

</mosaic_0001>

<bundles_post_ra>
// kernel: tpu_custom_call.1
= control target key start
LH: loop header
LB: loop body
LE: loop exit
PB: predicated region body
PF: predicated region fallthrough
CT: control target
= control target key end

     0   :  { %s2441_s0 = inlined_call_operand.hbm [shape: bf16[8,128], index: 0, kind: input, shape index: {}]   ;;  %s2442_s1 = inlined_call_operand.hbm [shape: f32[8,128], index: 1, kind: input, shape index: {}]   ;;  %s2443_s2 = inlined_call_operand.vmem [shape: s32[1,512], index: 2, kind: input, shape index: {}]   ;;  %s2444_s3 = inlined_call_operand.hbm [shape: s32[1,512], index: 3, kind: input, shape index: {}]   ;;  %s2445_s4 = inlined_call_operand.hbm [shape: bf16[64,128], index: 4, kind: input, shape index: {}]   ;;  %s2446_s5 = inlined_call_operand.vmem [shape: f32[8,128], index: 5, kind: input, shape index: {}]   ;;  %s2447_s6 = inlined_call_operand.hbm [shape: bf16[64,512], index: 6, kind: input, shape index: {}]   ;;  %s2448_s7 = inlined_call_operand.hbm [shape: f32[8,512], index: 7, kind: input, shape index: {}]   ;;  %s2449_s8 = inlined_call_operand.hbm [shape: f32[8,128], index: 8, kind: output, shape index: {}]  }
   0x1   :  { %2461 = sst [smem:[#allocation22_spill]] %s2441_s0 }
   0x2   :  { %2462 = sst [smem:[#allocation23_spill]] %s2442_s1 }
   0x3   :  { %2463 = sst [smem:[#allocation24_spill]] %s2446_s5 }
   0x4   :  { %2464 = sst [smem:[#allocation25_spill]] %s2447_s6 }
   0x5   :  { %2465 = sst [smem:[#allocation26_spill]] %s2449_s8 }
   0x6   :  { %13 = vsyncpa [#allocation3], 0 }
   0x7   :  { %14 = vsyncpa [#allocation6], 0 }
   0x8   :  { %15 = vsyncpa [#allocation10], 0 }
   0x9   :  { %17 = vsyncpa [#allocation10 + $0x1], 0 }
   0xa   :  { %18 = vsyncpa [#allocation4], 0  ;;  %s1849_s27 = smov 0   ;;  %s1851_s28 = smov 0  }
   0xb   :  { %s1853_s29 = smov 0   ;;  %s1855_s30 = smov 0  }
   0xc   :  { %s1857_s9 = smov 0   ;;  %s1859_s10 = smov 0  }
   0xd LB: > { %2466 = sst [smem:[#allocation19_spill]] %s1776_s29  ;;  %s1878_s11 = sadd.s32 4294967295, %s1788_s10   ;;  %s1788_s10 = sphi %s1859_s10, %s24_s10   ;;  %s1784_s9 = sphi %s1857_s9, %s2506_s9   ;;  %s1780_s30 = sphi %s1855_s30, %s2505_s30   ;;  %s1776_s29 = sphi %s1853_s29, %s2501_s29   ;;  %s1772_s28 = sphi %s1851_s28, %s2504_s28   ;;  %s1768_s27 = sphi %s1849_s27, %s2503_s27  }
   0xe   : > { %p123_p0 = scmp.ne.s32.totalorder %s1776_s29, %s1772_s28  ;;  %p124_p1 = scmp.eq.s32.totalorder %s1788_s10, 0 }
   0xf   : > { %p129_p2 = scmp.ne.s32.totalorder %s1772_s28, %s1768_s27  ;;  %p2450_p3 = scmp.eq.s32.totalorder %s1878_s11, 0 }
  0x10   : > { %p125_p4 = por %p124_p1, %p123_p0  ;;  %p1227_p5 = scmp.ge.s32.totalorder %s1788_s10, 1 }
  0x11   : > { %p1889_p6 = por %p2450_p3, %p129_p2  ;;  %p270_p7 = scmp.lt.s32.totalorder %s1788_s10, 3 }
  0x12   : > { %s1790_s15 = smov [#allocation2]   ;;  %p1451_p10 = scmp.lt.s32.totalorder %s1788_s10, 2 }
  0x13   : > { %s2467_s13 = scalar_select %p1889_p6, 1, 0 }
  0x14   : > { %p1894_p8 = pnand %p1227_p5, %p270_p7  ;;  %s283_s16 = sshll.u32 %s1790_s15, 4  ;;  %s284_s16 = int_to_ptr.vmem [resolvable:$true] %s283_s16 }
  0x15   : > { %p1907_p12 = pnand %p1451_p10, %p125_p4  ;;  %s1791_s19 = smov [#allocation5]  }
  0x16   : > { %s2468_s14 = scalar_select %p1894_p8, 1, 0 }
  0x17   : > { %p1428_p9 = pneg %p1894_p8  ;;  %s296_s20 = sshll.u32 %s1791_s19, 4  ;;  %s297_s20 = int_to_ptr.vmem [resolvable:$true] %s296_s20 }
  0x18   : > { %s2470_s18 = scalar_select %p1907_p12, 1, 0 }
  0x19   : > { %p1903_p11 = pnand %p1428_p9, %p2450_p3  ;;  %s2471_s0 = sld [smem:[#allocation22_spill]] }
  0x1b   : > { %s2469_s17 = scalar_select %p1903_p11, 1, 0 }
  0x1c   : > { %p1919_p0 = pneg %p1903_p11 }
  0x1e   : > { %s2472_s26 = scalar_select %p1919_p0, 1, 0 }
  0x1f   : > { %s1518_s23 = scalar_lea.hbm %s2471_s0, 64 }
  0x20   : > { %p1519_p13 = scmp.ne.s32.totalorder %s2471_s0, %s1518_s23  ;;  %p1525_p4 = scmp.lt.u32.totalorder %s1518_s23, %s2471_s0 }
  0x22   : > { %p1521_p1 = pnand %p1919_p0, %p1519_p13 }
  0x24   : > { %p1522_p2 = pneg %p1521_p1 }
  0x26   : > { %p1527_p5 = pnand %p1525_p4, %p1522_p2 }
  0x28   : > { %1530 = shalt.err (!%p1527_p5)
}
  0x29   : > { %s1531_s19 = scalar_lea.vmem %s284_s16, 64  ;;  %p1539_p3 = scmp.lt.s32.totalorder %s284_s16, %s284_s16 }
  0x2a   : > { %p1532_p7 = scmp.ne.s32.totalorder %s284_s16, %s1531_s19  ;;  %p1540_p6 = scmp.lt.s32.totalorder %s1531_s19, %s1531_s19 }
  0x2c   : > { %p1534_p9 = pnand %p1532_p7, %p1919_p0  ;;  %p1541_p8 = por %p1540_p6, %p1539_p3 }
  0x2e   : > { %p1535_p10 = pneg %p1534_p9 }
  0x30   : > { %p1542_p12 = pnand %p1541_p8, %p1535_p10 }
  0x32   : > { %1545 = shalt.err (!%p1542_p12)
}
  0x33   : > { %1431 = dma.hbm_to_vmem [thread:$0]  (!%p1903_p11), %s2471_s0, 64, %s284_s16, [#allocation3]  }
  0x34   : > { %s33_s23 = sadd.s32 1, %s1784_s9  ;;  %s2473_s1 = sld [smem:[#allocation23_spill]] }
  0x3a   : > { %s1546_s27 = scalar_lea.hbm %s2473_s1, 128 }
  0x3b   : > { %p1547_p3 = scmp.ne.s32.totalorder %s2473_s1, %s1546_s27  ;;  %p1553_p12 = scmp.lt.u32.totalorder %s1546_s27, %s2473_s1 }
  0x3d   : > { %p1549_p6 = pnand %p1547_p3, %p1919_p0 }
  0x3f   : > { %p1550_p8 = pneg %p1549_p6 }
  0x41   : > { %p1555_p13 = pnand %p1553_p12, %p1550_p8 }
  0x43   : > { %1558 = shalt.err (!%p1555_p13)
}
  0x44   : > { %s1559_s16 = scalar_lea.vmem %s297_s20, 128  ;;  %p1567_p5 = scmp.lt.s32.totalorder %s297_s20, %s297_s20 }
  0x45   : > { %p1560_p1 = scmp.ne.s32.totalorder %s297_s20, %s1559_s16  ;;  %p1568_p7 = scmp.lt.s32.totalorder %s1559_s16, %s1559_s16 }
  0x47   : > { %p1562_p2 = pnand %p1560_p1, %p1919_p0  ;;  %p1569_p9 = por %p1568_p7, %p1567_p5 }
  0x49   : > { %p1563_p4 = pneg %p1562_p2 }
  0x4b   : > { %p1570_p10 = pnand %p1569_p9, %p1563_p4 }
  0x4d   : > { %1573 = shalt.err (!%p1570_p10)
}
  0x4e   : > { %1434 = dma.hbm_to_vmem [thread:$0]  (!%p1903_p11), %s2473_s1, 128, %s297_s20, [#allocation6]  }
  0x4f   : > { %p34_p3 = scmp.ge.s32.totalorder %s33_s23, 2  ;;  %s1956_s22 = sand.u32 1, %s1776_s29  }
  0x50   : > { %s1236_s24 = sshll.u32 %s1956_s22, 6  ;;  %s1385_s25 = sshll.u32 %s1784_s9, 7 }
  0x51   : > { %s2508_s23 = smov (%p34_p3, %s33_s23), 0  ;;  %s2475_s6 = sld [smem:[#allocation25_spill]] }
  0x52   : > { %2474 = sst [smem:[#allocation20_spill]] %s2508_s23  ;;  %s113_s27 = ssub.s32 %s1784_s9, %s2508_s23 }
  0x53   : > { %p114_p6 = scmp.eq.s32.totalorder %s113_s27, 0  ;;  %s360_s20 = scalar_lea.vmem [#allocation9], %s1236_s24 }
  0x54   : > { %s367_s12 = sshll.u32 %s360_s20, 4  ;;  %s2476_s21 = sadd.s32 1, %s1776_s29  ;;  %s1974_s12 = int_to_ptr.vmem [resolvable:$true] %s367_s12 }
  0x55   : > { %s1972_s8 = scalar_select %p114_p6, %s1776_s29, %s2476_s21  }
  0x56   : > { %s2478_s0 = sand.u32 1, %s1788_s10   ;;  %p2479_p12 = scmp.ne.s32.totalorder %s2470_s18, 0 }
  0x57   : > { %s1967_s16 = scalar_lea.hbm %s2475_s6, %s1385_s25  ;;  %2477 = sst [smem:[#allocation21_spill]] %s1972_s8 }
  0x58   : > { %s1978_s1 = scalar_lea.sflag [#allocation10], %s2478_s0  ;;  %s1574_s27 = scalar_lea.hbm %s1967_s16, 1024 }
  0x59   : > { %p1575_p8 = scmp.ne.s32.totalorder %s1967_s16, %s1574_s27  ;;  %p1984_p13 = pneg %p2479_p12 }
  0x5a   : > { %s1579_s19 = scalar_lea.hbm %s2475_s6, 2048  ;;  %p1580_p4 = scmp.lt.u32.totalorder %s1967_s16, %s2475_s6 }
  0x5b   : > { %p1577_p1 = pnand %p1984_p13, %p1575_p8  ;;  %p1581_p5 = scmp.lt.u32.totalorder %s1579_s19, %s1574_s27 }
  0x5c   : > { %p1583_p9 = scmp.lt.u32.totalorder %s1574_s27, %s1967_s16 }
  0x5d   : > { %p1578_p2 = pneg %p1577_p1  ;;  %p1582_p7 = por %p1581_p5, %p1580_p4 }
  0x5f   : > { %p1584_p10 = por %p1583_p9, %p1582_p7 }
  0x61   : > { %p1585_p3 = pnand %p1584_p10, %p1578_p2 }
  0x63   : > { %1588 = shalt.err (!%p1585_p3)
}
  0x64   : > { %s1589_s0 = scalar_lea.vmem %s1974_s12, 1024  ;;  %s1792_s24 = smov [#allocation9]  }
  0x65   : > { %p1590_p6 = scmp.ne.s32.totalorder %s1974_s12, %s1589_s0  ;;  %s1594_s15 = sshll.u32 %s1792_s24, 4  ;;  %s1595_s15 = int_to_ptr.vmem [resolvable:$false] %s1594_s15 }
  0x66   : > { %s1596_s20 = scalar_lea.vmem %s1595_s15, 2048  ;;  %p1597_p11 = scmp.lt.s32.totalorder %s1974_s12, %s1595_s15 }
  0x67   : > { %p1592_p8 = pnand %p1590_p6, %p1984_p13  ;;  %p1598_p0 = scmp.lt.s32.totalorder %s1596_s20, %s1589_s0 }
  0x69   : > { %p1593_p1 = pneg %p1592_p8  ;;  %p1599_p4 = por %p1598_p0, %p1597_p11 }
  0x6b   : > { %p1600_p5 = pnand %p1599_p4, %p1593_p1 }
  0x6d   : > { %1603 = shalt.err (!%p1600_p5)
}
  0x6e   : > { %s1793_s27 = smov 256   ;;  %s1794_s19 = smov 128  }
  0x6f   : > { %s1795_s21 = smov 8   ;;  %s1796_s6 = smov [#allocation8]  }
  0x70   : > { %1444 = dma.hbm_to_vmem [thread:$0]  (!%p2479_p12), %s1967_s16, 1024, %s1974_s12, %s1978_s1, %s1793_s27, %s1794_s19, %s1795_s21  }
  0x71   : > { %s308_s23 = sshll.u32 %s1796_s6, 4  ;;  %s1604_s0 = scalar_lea.hbm %s2445_s4, 512  ;;  %s309_s23 = int_to_ptr.vmem [resolvable:$true] %s308_s23 }
  0x72   : > { %p1605_p11 = scmp.ne.s32.totalorder %s2445_s4, %s1604_s0  ;;  %p2481_p0 = scmp.ne.s32.totalorder %s2472_s26, 0 }
  0x73   : > { %p1611_p9 = scmp.lt.u32.totalorder %s1604_s0, %s2445_s4 }
  0x74   : > { %p1607_p2 = pnand %p1605_p11, %p2481_p0 }
  0x76   : > { %p1608_p7 = pneg %p1607_p2 }
  0x78   : > { %p1613_p10 = pnand %p1611_p9, %p1608_p7 }
  0x7a   : > { %1616 = shalt.err (!%p1613_p10)
}
  0x7b   : > { %s1617_s16 = scalar_lea.vmem %s309_s23, 512  ;;  %p1625_p1 = scmp.lt.s32.totalorder %s309_s23, %s309_s23 }
  0x7c   : > { %p1618_p3 = scmp.ne.s32.totalorder %s309_s23, %s1617_s16  ;;  %p1626_p4 = scmp.lt.s32.totalorder %s1617_s16, %s1617_s16 }
  0x7e   : > { %p1620_p6 = pnand %p1618_p3, %p2481_p0  ;;  %p1627_p5 = por %p1626_p4, %p1625_p1 }
  0x80   : > { %p1621_p8 = pneg %p1620_p6 }
  0x82   : > { %p1628_p12 = pnand %p1627_p5, %p1621_p8 }
  0x84   : > { %1631 = shalt.err (!%p1628_p12)
}
  0x85   : > { %s1797_s6 = smov 64   ;;  %s1798_s5 = smov 4  }
  0x86   : > { %p2482_p11 = scmp.ne.s32.totalorder %s2469_s17, 0  ;;  %s1233_s26 = sshll.u32 %s1956_s22, 1 }
  0x87   : > { %s1384_s12 = sshll.u32 %s1784_s9, 5  ;;  %s341_s24 = scalar_lea.vmem [#allocation7], %s1233_s26 }
  0x88   : > { %1437 = dma.hbm_to_vmem [thread:$0]  (!%p2482_p11), %s2445_s4, 512, %s309_s23, [#allocation6], %s1797_s6, %s1797_s6, %s1798_s5  }
  0x89   : > { %s2031_s21 = scalar_lea.hbm %s2444_s3, %s1384_s12  ;;  %s349_s0 = sshll.u32 %s341_s24, 4  ;;  %s2033_s0 = int_to_ptr.vmem [resolvable:$true] %s349_s0 }
  0x8a   : > { %s1239_s17 = sshll.u32 %s1956_s22, 4  ;;  %s2483_s15 = sand.u32 1, %s1788_s10  }
  0x8b   : > { %s338_s20 = scalar_lea.sflag [#allocation3], %s2483_s15  ;;  %s1632_s16 = scalar_lea.hbm %s2031_s21, 32 }
  0x8c   : > { %p1633_p12 = scmp.ne.s32.totalorder %s2031_s21, %s1632_s16  ;;  %s1637_s5 = scalar_lea.hbm %s2444_s3, 64 }
  0x8d   : > { %p1638_p7 = scmp.lt.u32.totalorder %s2031_s21, %s2444_s3  ;;  %p1639_p9 = scmp.lt.u32.totalorder %s1637_s5, %s1632_s16 }
  0x8e   : > { %p1635_p0 = pnand %p1633_p12, %p1984_p13  ;;  %p1641_p3 = scmp.lt.u32.totalorder %s1632_s16, %s2031_s21 }
  0x8f   : > { %p1640_p10 = por %p1639_p9, %p1638_p7 }
  0x90   : > { %p1636_p2 = pneg %p1635_p0 }
  0x91   : > { %p1642_p6 = por %p1641_p3, %p1640_p10 }
  0x93   : > { %p1643_p8 = pnand %p1642_p6, %p1636_p2 }
  0x95   : > { %1646 = shalt.err (!%p1643_p8)
}
  0x96   : > { %s1647_s26 = scalar_lea.vmem %s2033_s0, 32  ;;  %s1799_s12 = smov [#allocation7]  }
  0x97   : > { %p1648_p1 = scmp.ne.s32.totalorder %s2033_s0, %s1647_s26  ;;  %s1652_s27 = sshll.u32 %s1799_s12, 4  ;;  %s1653_s27 = int_to_ptr.vmem [resolvable:$false] %s1652_s27 }
  0x98   : > { %s1654_s19 = scalar_lea.vmem %s1653_s27, 64  ;;  %p1655_p11 = scmp.lt.s32.totalorder %s2033_s0, %s1653_s27 }
  0x99   : > { %p1650_p4 = pnand %p1648_p1, %p1984_p13  ;;  %p1656_p12 = scmp.lt.s32.totalorder %s1654_s19, %s1647_s26 }
  0x9b   : > { %p1651_p5 = pneg %p1650_p4  ;;  %p1657_p0 = por %p1656_p12, %p1655_p11 }
  0x9d   : > { %p1658_p7 = pnand %p1657_p0, %p1651_p5 }
  0x9f   : > { %1661 = shalt.err (!%p1658_p7)
}
  0xa0   : > { %p2484_p2 = scmp.ne.s32.totalorder %s2470_s18, 0  ;;  %s1386_s24 = sshll.u32 %s1784_s9, 8 }
  0xa1   : > { %s2063_s23 = scalar_lea.hbm %s2448_s7, %s1386_s24  ;;  %s381_s6 = scalar_lea.vmem [#allocation11], %s1239_s17 }
  0xa2   : > { %1441 = dma.hbm_to_vmem [thread:$0]  (!%p2484_p2), %s2031_s21, 32, %s2033_s0, %s338_s20  }
  0xa3   : > { %s389_s5 = sshll.u32 %s381_s6, 4  ;;  %s1662_s29 = scalar_lea.hbm %s2063_s23, 256  ;;  %s390_s5 = int_to_ptr.vmem [resolvable:$true] %s389_s5 }
  0xa4   : > { %p1663_p9 = scmp.ne.s32.totalorder %s2063_s23, %s1662_s29  ;;  %s1667_s20 = scalar_lea.hbm %s2448_s7, 512 }
  0xa5   : > { %p1668_p6 = scmp.lt.u32.totalorder %s2063_s23, %s2448_s7  ;;  %p1669_p8 = scmp.lt.u32.totalorder %s1667_s20, %s1662_s29 }
  0xa6   : > { %p1665_p10 = pnand %p1663_p9, %p1984_p13  ;;  %p1671_p4 = scmp.lt.u32.totalorder %s1662_s29, %s2063_s23 }
  0xa7   : > { %p1670_p1 = por %p1669_p8, %p1668_p6 }
  0xa8   : > { %p1666_p3 = pneg %p1665_p10 }
  0xa9   : > { %p1672_p5 = por %p1671_p4, %p1670_p1 }
  0xab   : > { %p1673_p11 = pnand %p1672_p5, %p1666_p3 }
  0xad   : > { %1676 = shalt.err (!%p1673_p11)
}
  0xae   : > { %s1677_s22 = scalar_lea.vmem %s390_s5, 256  ;;  %s1800_s17 = smov [#allocation11]  }
  0xaf   : > { %p1678_p12 = scmp.ne.s32.totalorder %s390_s5, %s1677_s22  ;;  %s1682_s12 = sshll.u32 %s1800_s17, 4  ;;  %s1683_s12 = int_to_ptr.vmem [resolvable:$false] %s1682_s12 }
  0xb0   : > { %s1684_s27 = scalar_lea.vmem %s1683_s12, 512  ;;  %p1685_p9 = scmp.lt.s32.totalorder %s390_s5, %s1683_s12 }
  0xb1   : > { %p1680_p0 = pnand %p1678_p12, %p1984_p13  ;;  %p1686_p10 = scmp.lt.s32.totalorder %s1684_s27, %s1677_s22 }
  0xb3   : > { %p1681_p7 = pneg %p1680_p0  ;;  %p1687_p2 = por %p1686_p10, %p1685_p9 }
  0xb5   : > { %p1688_p6 = pnand %p1687_p2, %p1681_p7 }
  0xb7   : > { %1691 = shalt.err (!%p1688_p6)
}
  0xb8   : > { %p2485_p8 = scmp.ne.s32.totalorder %s2470_s18, 0  ;;  %p2486_p3 = scmp.ne.s32.totalorder %s2468_s14, 0 }
  0xb9   : > { %p2487_p13 = scmp.eq.s32.totalorder (!%p2486_p3), %s1878_s11, 0 }
  0xba   : > { %1447 = dma.hbm_to_vmem [thread:$0]  (!%p2485_p8), %s2063_s23, 256, %s390_s5, %s1978_s1  }
  0xbb   : > { %398 = sbr.rel (%p2486_p3) target bundleno = 783 (0x30f), region = 52 }
  0xc2   : > { %1743 = dma.done.wait (%p2487_p13), [#allocation3], 64   ;;  %p2488_p1 = pmov %p2487_p13 }
  0xc4   : > { %1745 = vsyncadd (%p2488_p1), [#allocation3], 4294967232  ;;  %p2489_p4 = pmov %p2488_p1 }
  0xc5   : > { %p2490_p2 = pmov %p2488_p1 }
  0xc6   : > { %1747 = dma.done.wait (%p2489_p4), [#allocation6], 128  }
  0xc7   : > { %1749 = vsyncadd (%p2490_p2), [#allocation6], 4294967168  ;;  %s408_s18 = sand.u32 1, %s1878_s11   ;;  %s410_s1 = sand.u32 1, %s1772_s28  }
  0xc8   : > { %s1245_s25 = sshll.u32 %s410_s1, 1  ;;  %s409_s14 = scalar_lea.sflag [#allocation3], %s408_s18 }
  0xc9   : > { %s2097_s19 = scalar_lea.vmem [#allocation7], %s1245_s25  ;;  %p2491_p5 = scmp.ne.s32.totalorder %s2467_s13, 0 }
  0xcb   : > { %1751 = dma.done.wait (%p2491_p5), %s409_s14, 32  }
  0xcc   : > { %1753 = vsyncadd (%p2491_p5), %s409_s14, 4294967264  ;;  %p2492_p11 = pmov %p2488_p1 }
  0xcd   : > { %p2493_p12 = pmov %p2488_p1 }
  0xce   : > { %1755 = dma.done.wait (%p2492_p11), [#allocation6], 512  }
  0xcf   : > { %1757 = vsyncadd (%p2493_p12), [#allocation6], 4294966784  ;;  %s1247_s24 = sshll.u32 %s410_s1, 6  ;;  %s422_s15 = scalar_lea.sflag [#allocation10], %s408_s18 }
  0xd0   : > { %s2107_s16 = scalar_lea.vmem [#allocation9], %s1247_s24 }
  0xd1   : > { %1759 = dma.done.wait (%p2491_p5), %s422_s15, 1280  }
  0xd2   : > { %1761 = vsyncadd (%p2491_p5), %s422_s15, 4294966016  ;;  %s1248_s23 = sshll.u32 %s410_s1, 4  ;;  %s1249_s6 = sshll.u32 %s1780_s30, 1 }
  0xd3   : > { %p481_p0 = scmp.lt.s32.totalorder %s1249_s6, 3  ;;  %s2120_s0 = scalar_lea.vmem [#allocation11], %s1248_s23 }
  0xd4   : > { %p1250_p7 = scmp.ne.s32.totalorder %s1780_s30, 0 }
  0xd5   : > { %s2510_s6 = smov (!%p481_p0, %s1249_s6), 3  ;;  %v516_v0 = vlaneseq (!%p1250_p7)  ;;  %v1388_v1 = vld [vmem:[#allocation8] sm:$0xff] (!%p1250_p7)   ;;  %v1403_v2 = vld [vmem:[#allocation8 + $0x8] sm:$0xff] (!%p1250_p7)   ;;  %v498_v4 = vld [vmem:[#allocation5] sm:$0xff] (!%p1250_p7)  ;;  %s2494_s8 = sld [smem:[#allocation24_spill]] (!%p1250_p7) }
  0xd6   : > { %s483_s21 = scalar_lea.vmem %s2443_s2, %s2510_s6  ;;  %497 = sbr.rel (%p1250_p7) target bundleno = 240 (0xf0), region = 80  ;;  %v1389_v5 = vunpack.c.l.bf16 (!%p1250_p7), %v1388_v1  ;;  %v1390_v6 = vunpack.c.h.bf16 (!%p1250_p7), %v1388_v1  ;;  %v1393_v11 = vunpack.c.l.bf16 (!%p1250_p7), %v1403_v2  ;;  %v1404_v12 = vld [vmem:[#allocation8 + $0x10] sm:$0xff] (!%p1250_p7)   ;;  %v1394_v17 = vunpack.c.h.bf16 (!%p1250_p7), %v1403_v2  ;;  %v1405_v29 = vld [vmem:[#allocation8 + $0x18] sm:$0xff] (!%p1250_p7)  }
  0xd7   : > { %v517_v3 = vshrl.u32 (!%p1250_p7), %v516_v0, 7  ;;  %v1397_v23 = vunpack.c.l.bf16 (!%p1250_p7), %v1404_v12  ;;  %v1398_v28 = vunpack.c.h.bf16 (!%p1250_p7), %v1404_v12  ;;  %v1401_v34 = vunpack.c.l.bf16 (!%p1250_p7), %v1405_v29 }
  0xd8   : > { %v1402_v38 = vunpack.c.h.bf16 (!%p1250_p7), %v1405_v29 }
  0xd9   : > { %v518_v7 = vsub.s32 (!%p1250_p7), 0, %v517_v3  ;;  %v524_v8 = vsub.s32 (!%p1250_p7), 1, %v517_v3  ;;  %v530_v9 = vsub.s32 (!%p1250_p7), 2, %v517_v3  ;;  %v536_v10 = vsub.s32 (!%p1250_p7), 3, %v517_v3 }
  0xda   : > { %v542_v16 = vsub.s32 (!%p1250_p7), 4, %v517_v3  ;;  %v548_v22 = vsub.s32 (!%p1250_p7), 5, %v517_v3  ;;  %v554_v27 = vsub.s32 (!%p1250_p7), 6, %v517_v3  ;;  %v560_v33 = vsub.s32 (!%p1250_p7), 7, %v517_v3 }
  0xdb   : > { %v519_v13 = vrot.slane (!%p1250_p7), %v498_v4, %v518_v7  ;;  %v525_v14 = vrot.slane (!%p1250_p7), %v498_v4, %v524_v8  ;;  %v531_v15 = vrot.slane (!%p1250_p7), %v498_v4, %v530_v9  ;;  %v515_v18 = vld [vmem:[%s2494_s8] sm:$0xff] (!%p1250_p7)  ;;  %v537_v21 = vrot.slane (!%p1250_p7), %v498_v4, %v536_v10 }
  0xdc   : > { %v543_v26 = vrot.slane (!%p1250_p7), %v498_v4, %v542_v16  ;;  %v549_v32 = vrot.slane (!%p1250_p7), %v498_v4, %v548_v22  ;;  %v555_v37 = vrot.slane (!%p1250_p7), %v498_v4, %v554_v27  ;;  %v561_v41 = vrot.slane (!%p1250_p7), %v498_v4, %v560_v33 }
  0xdd   : > { %v520_v19 = vmul.f32 %v1389_v5, %v519_v13  ;;  %v526_v20 = vmul.f32 %v1390_v6, %v525_v14  ;;  %v532_v25 = vmul.f32 %v1393_v11, %v531_v15  ;;  %v538_v31 = vmul.f32 %v1394_v17, %v537_v21 }
  0xde   : > { %v544_v36 = vmul.f32 %v1397_v23, %v543_v26  ;;  %v550_v40 = vmul.f32 %v1398_v28, %v549_v32  ;;  %v556_v43 = vmul.f32 %v1401_v34, %v555_v37  ;;  %v562_v45 = vmul.f32 %v1402_v38, %v561_v41 }
  0xdf   : > { %v521_v24 = vadd.f32 %v520_v19, %v515_v18 }
  0xe1   : > { %v527_v30 = vadd.f32 %v526_v20, %v521_v24 }
  0xe3   : > { %v533_v35 = vadd.f32 %v532_v25, %v527_v30 }
  0xe5   : > { %v539_v39 = vadd.f32 %v538_v31, %v533_v35 }
  0xe7   : > { %v545_v42 = vadd.f32 %v544_v36, %v539_v39 }
  0xe9   : > { %v551_v44 = vadd.f32 %v550_v40, %v545_v42 }
  0xeb   : > { %v557_v46 = vadd.f32 %v556_v43, %v551_v44 }
  0xed   : > { %v563_v47 = vadd.f32 %v562_v45, %v557_v46 }
  0xef   : > { %564 = vst [vmem:[#allocation12] sm:$0xff] %v563_v47 }
  0xf0 PF: > { %v566_v48 = vlaneseq  ;;  %v1801_v49 = vmov 0   ;;  %v565_v51 = vld [vmem:[%s483_s21] sm:$0x3]  ;;  %v1802_v61 = vmov 1.0|1.0   ;;  %v745_v14 = vld [vmem:[%s2107_s16] sm:$0xff] }
  0xf1   : > { %736 = vmatprep.mubr.bf16.mxu0 %v1801_v49  ;;  %v867_v2 = vld [vmem:[%s2097_s19] sm:$0x3]  ;;  %v703_v13 = vld [vmem:[#allocation2] sm:$0xf]  ;;  %v746_v15 = vld [vmem:[%s2107_s16 + $0x8] sm:$0xff]  ;;  %v754_v17 = vunpack.c.h.bf16 %v745_v14  ;;  %v753_v21 = vunpack.c.l.bf16 %v745_v14  ;;  %p1379_p9 = scmp.ne.s32.totalorder %s1780_s30, 1 }
  0xf2   : > { %v2126_v50 = vshrl.u32 %v566_v48, 7  ;;  %v747_v20 = vld [vmem:[%s2107_s16 + $0x10] sm:$0xff]  ;;  %v748_v25 = vld [vmem:[%s2107_s16 + $0x18] sm:$0xff]  ;;  %v756_v26 = vunpack.c.h.bf16 %v746_v15  ;;  %v755_v30 = vunpack.c.l.bf16 %v746_v15  ;;  %v749_v36 = vld [vmem:[%s2107_s16 + $0x20] sm:$0xff] }
  0xf3   : > { %v770_v31 = vld [vmem:[%s2120_s0 + $0x8] sm:$0xff]  ;;  %v758_v37 = vunpack.c.h.bf16 %v747_v20  ;;  %v757_v40 = vunpack.c.l.bf16 %v747_v20  ;;  %v760_v41 = vunpack.c.h.bf16 %v748_v25  ;;  %v769_v44 = vld [vmem:[%s2120_s0] sm:$0xff] }
  0xf4   : > { %v2134_v52 = vadd.s32 8, %v2126_v50  ;;  %v2137_v53 = vsub.s32 1, %v2126_v50  ;;  %v2140_v54 = vsub.s32 0, %v2126_v50  ;;  %v2143_v55 = vadd.s32 16, %v2126_v50  ;;  %v750_v45 = vld [vmem:[%s2107_s16 + $0x28] sm:$0xff] }
  0xf5   : > { %v2146_v56 = vadd.s32 24, %v2126_v50  ;;  %v2155_v59 = vadd.s32 32, %v2126_v50  ;;  %v2158_v60 = vadd.s32 40, %v2126_v50  ;;  %v2182_v62 = vadd.s32 48, %v2126_v50 }
  0xf6   : > { %v2149_v57 = vrot.slane %v565_v51, %v2137_v53  ;;  %v2152_v58 = vrot.slane %v565_v51, %v2140_v54  ;;  %v2185_v63 = vadd.s32 56, %v2126_v50  ;;  %v2198_v0 = vadd.s32 64, %v2126_v50 }
  0xf7   : > { %v2201_v1 = vadd.s32 72, %v2126_v50  ;;  %v2211_v3 = vadd.s32 80, %v2126_v50  ;;  %v2214_v4 = vadd.s32 88, %v2126_v50  ;;  %v2221_v5 = vrot.slane %v867_v2, %v2137_v53 }
  0xf8   : > { %vm592_vm0 = vcmp.eq.s32.totalorder %v2126_v50, %v2149_v57  ;;  %vm594_vm1 = vcmp.eq.s32.totalorder %v2134_v52, %v2149_v57  ;;  %vm591_vm2 = vcmp.eq.s32.totalorder %v2126_v50, %v2152_v58  ;;  %vm593_vm3 = vcmp.eq.s32.totalorder %v2134_v52, %v2152_v58 }
  0xf9   : > { %vm1283_vm4 = vmpackc.low %vm594_vm1, %vm592_vm0  ;;  %vm596_vm5 = vcmp.eq.s32.totalorder %v2143_v55, %v2149_v57  ;;  %vm598_vm6 = vcmp.eq.s32.totalorder %v2146_v56, %v2149_v57  ;;  %vm595_vm7 = vcmp.eq.s32.totalorder %v2143_v55, %v2152_v58  ;;  %vm597_vm8 = vcmp.eq.s32.totalorder %v2146_v56, %v2152_v58 }
  0xfa   : > { %1284 = vmatprep.subr.msk.bf16.mxu0 %vm1283_vm4, %v1802_v61  ;;  %vm1285_vm9 = vmpackc.low %vm593_vm3, %vm591_vm2  ;;  %vm600_vm10 = vcmp.eq.s32.totalorder %v2155_v59, %v2149_v57  ;;  %vm602_vm11 = vcmp.eq.s32.totalorder %v2158_v60, %v2149_v57  ;;  %vm599_vm15 = vcmp.eq.s32.totalorder %v2155_v59, %v2152_v58  ;;  %vm601_vm0 = vcmp.eq.s32.totalorder %v2158_v60, %v2152_v58 }
  0xfb   : > { %1286 = vmatpush1.bf16.msk.msra.mxu0 %vm1285_vm9, %v1802_v61  ;;  %vm1287_vm12 = vmpackc.low %vm598_vm6, %vm596_vm5  ;;  %vm604_vm1 = vcmp.eq.s32.totalorder %v2182_v62, %v2149_v57  ;;  %vm606_vm2 = vcmp.eq.s32.totalorder %v2185_v63, %v2149_v57  ;;  %vm603_vm5 = vcmp.eq.s32.totalorder %v2182_v62, %v2152_v58  ;;  %vm605_vm6 = vcmp.eq.s32.totalorder %v2185_v63, %v2152_v58 }
  0xfc   : > { %1288 = vmatprep.subr.msk.bf16.mxu0 %vm1287_vm12, %v1802_v61  ;;  %vm1289_vm13 = vmpackc.low %vm597_vm8, %vm595_vm7  ;;  %vm608_vm7 = vcmp.eq.s32.totalorder %v2198_v0, %v2149_v57  ;;  %vm610_vm8 = vcmp.eq.s32.totalorder %v2201_v1, %v2149_v57  ;;  %v2225_v6 = vrot.slane %v867_v2, %v2140_v54  ;;  %v2237_v7 = vadd.s32 96, %v2126_v50 }
  0xfd   : > { %vm1291_vm14 = vmpackc.low %vm602_vm11, %vm600_vm10  ;;  %vm607_vm10 = vcmp.eq.s32.totalorder %v2198_v0, %v2152_v58  ;;  %vm609_vm11 = vcmp.eq.s32.totalorder %v2201_v1, %v2152_v58  ;;  %v2240_v8 = vadd.s32 104, %v2126_v50  ;;  %v2261_v11 = vadd.s32 112, %v2126_v50 }
  0xfe   : > { %vm1293_vm3 = vmpackc.low %vm601_vm0, %vm599_vm15  ;;  %vm894_vm15 = vcmp.eq.s32.totalorder %v2126_v50, %v2221_v5  ;;  %vm896_vm0 = vcmp.eq.s32.totalorder %v2134_v52, %v2221_v5  ;;  %v2264_v12 = vadd.s32 120, %v2126_v50  ;;  %v797_v18 = vsub.s32 2, %v2126_v50 }
  0xff   : > { %1290 = vmatpush1.bf16.msk.msra.mxu0 %vm1289_vm13, %v1802_v61  ;;  %vm1295_vm4 = vmpackc.low %vm606_vm2, %vm604_vm1  ;;  %vm612_vm13 = vcmp.eq.s32.totalorder %v2211_v3, %v2149_v57  ;;  %vm893_vm2 = vcmp.eq.s32.totalorder %v2126_v50, %v2225_v6  ;;  %v809_v22 = vsub.s32 3, %v2126_v50  ;;  %v821_v32 = vsub.s32 4, %v2126_v50 }
 0x100   : > { %1292 = vmatprep.subr.msk.bf16.mxu0 %vm1291_vm14, %v1802_v61  ;;  %vm1297_vm9 = vmpackc.low %vm605_vm6, %vm603_vm5  ;;  %vm614_vm14 = vcmp.eq.s32.totalorder %v2214_v4, %v2149_v57  ;;  %vm898_vm5 = vcmp.eq.s32.totalorder %v2143_v55, %v2221_v5  ;;  %vm900_vm6 = vcmp.eq.s32.totalorder %v2146_v56, %v2221_v5  ;;  %v833_v33 = vsub.s32 5, %v2126_v50 }
 0x101   : > { %vm1299_vm12 = vmpackc.low %vm610_vm8, %vm608_vm7  ;;  %vm611_vm7 = vcmp.eq.s32.totalorder %v2211_v3, %v2152_v58  ;;  %vm613_vm8 = vcmp.eq.s32.totalorder %v2214_v4, %v2152_v58  ;;  %v845_v34 = vsub.s32 6, %v2126_v50  ;;  %v857_v43 = vsub.s32 7, %v2126_v50 }
 0x102   : > { %vm2247_vm1 = vmpackc.low %vm609_vm11, %vm607_vm10  ;;  %vm616_vm10 = vcmp.eq.s32.totalorder %v2237_v7, %v2149_v57  ;;  %vm618_vm11 = vcmp.eq.s32.totalorder %v2240_v8, %v2149_v57  ;;  %v759_v51 = vunpack.c.l.bf16 %v748_v25  ;;  %v764_v50 = vunpack.c.h.bf16 %v750_v45 }
 0x103   : > { %1294 = vmatpush1.bf16.msk.msra.mxu0 %vm1293_vm3, %v1802_v61  ;;  %vm895_vm3 = vcmp.eq.s32.totalorder %v2134_v52, %v2225_v6  ;;  %v762_v52 = vunpack.c.h.bf16 %v749_v36 }
 0x104   : > { %1296 = vmatprep.subr.msk.bf16.mxu0 %vm1295_vm4, %v1802_v61  ;;  %vm2256_vm4 = vmpackc.low %vm614_vm14, %vm612_vm13  ;;  %vm615_vm13 = vcmp.eq.s32.totalorder %v2237_v7, %v2152_v58  ;;  %vm617_vm14 = vcmp.eq.s32.totalorder %v2240_v8, %v2152_v58 }
 0x107   : > { %1298 = vmatpush1.bf16.msk.msra.mxu0 %vm1297_vm9, %v1802_v61  ;;  %vm1347_vm9 = vmpackc.low %vm896_vm0, %vm894_vm15 }
 0x108   : > { %1300 = vmatprep.subr.msk.bf16.mxu0 %vm1299_vm12, %v1802_v61  ;;  %1348 = vmatprep.subr.msk.bf16.mxu1 %vm1347_vm9, %v1802_v61  ;;  %vm1349_vm12 = vmpackc.low %vm895_vm3, %vm893_vm2  ;;  %vm620_vm2 = vcmp.eq.s32.totalorder %v2261_v11, %v2149_v57  ;;  %vm897_vm9 = vcmp.eq.s32.totalorder %v2143_v55, %v2225_v6  ;;  %v751_v55 = vld [vmem:[%s2107_s16 + $0x30] sm:$0xff] }
 0x109   : > { %1350 = vmatpush1.bf16.xpose.msk.msra.mxu1 %vm1349_vm12, %v1802_v61  ;;  %vm1351_vm15 = vmpackc.low %vm900_vm6, %vm898_vm5  ;;  %vm899_vm5 = vcmp.eq.s32.totalorder %v2146_v56, %v2225_v6 }
 0x10a   : > { %vm1305_vm0 = vmpackc.low %vm613_vm8, %vm611_vm7  ;;  %1352 = vmatprep.subr.msk.bf16.mxu1 %vm1351_vm15, %v1802_v61  ;;  %vm904_vm7 = vcmp.eq.s32.totalorder %v2158_v60, %v2221_v5 }
 0x10b   : > { %1302 = vmatpush1.bf16.msk.msra.mxu0 %vm2247_vm1, %v1802_v61  ;;  %vm622_vm1 = vcmp.eq.s32.totalorder %v2264_v12, %v2149_v57  ;;  %vm1307_vm3 = vmpackc.low %vm618_vm11, %vm616_vm10  ;;  %vm619_vm10 = vcmp.eq.s32.totalorder %v2261_v11, %v2152_v58  ;;  %vm621_vm11 = vcmp.eq.s32.totalorder %v2264_v12, %v2152_v58 }
 0x10c   : > { %1304 = vmatprep.subr.msk.bf16.mxu0 %vm2256_vm4, %v1802_v61  ;;  %vm1309_vm6 = vmpackc.low %vm617_vm14, %vm615_vm13  ;;  %vm902_vm4 = vcmp.eq.s32.totalorder %v2155_v59, %v2221_v5  ;;  %vm901_vm14 = vcmp.eq.s32.totalorder %v2155_v59, %v2225_v6 }
 0x10d   : > { %vm1311_vm8 = vmpackc.low %vm622_vm1, %vm620_vm2  ;;  %vm906_vm2 = vcmp.eq.s32.totalorder %v2182_v62, %v2221_v5  ;;  %vm908_vm1 = vcmp.eq.s32.totalorder %v2185_v63, %v2221_v5 }
 0x10e   : > { %vm1353_vm12 = vmpackc.low %vm899_vm5, %vm897_vm9  ;;  %vm905_vm5 = vcmp.eq.s32.totalorder %v2182_v62, %v2225_v6 }
 0x10f   : > { %1306 = vmatpush1.bf16.msk.msra.mxu0 %vm1305_vm0, %v1802_v61  ;;  %vm1355_vm15 = vmpackc.low %vm904_vm7, %vm902_vm4  ;;  %vm903_vm0 = vcmp.eq.s32.totalorder %v2158_v60, %v2225_v6  ;;  %vm910_vm4 = vcmp.eq.s32.totalorder %v2198_v0, %v2221_v5  ;;  %vm912_vm7 = vcmp.eq.s32.totalorder %v2201_v1, %v2221_v5  ;;  %v761_v60 = vunpack.c.l.bf16 %v749_v36 }
 0x110   : > { %1308 = vmatprep.subr.msk.bf16.mxu0 %vm1307_vm3, %v1802_v61  ;;  %vm1313_vm13 = vmpackc.low %vm621_vm11, %vm619_vm10  ;;  %vm909_vm10 = vcmp.eq.s32.totalorder %v2198_v0, %v2225_v6  ;;  %vm911_vm11 = vcmp.eq.s32.totalorder %v2201_v1, %v2225_v6 }
 0x111   : > { %1354 = vmatpush1.bf16.xpose.msk.msra.mxu1 %vm1353_vm12, %v1802_v61  ;;  %vm1357_vm3 = vmpackc.low %vm903_vm0, %vm901_vm14  ;;  %vm916_vm14 = vcmp.eq.s32.totalorder %v2214_v4, %v2221_v5 }
 0x112   : > { %1356 = vmatprep.subr.msk.bf16.mxu1 %vm1355_vm15, %v1802_v61  ;;  %vm1359_vm9 = vmpackc.low %vm908_vm1, %vm906_vm2  ;;  %vm913_vm2 = vcmp.eq.s32.totalorder %v2211_v3, %v2225_v6  ;;  %vm915_vm1 = vcmp.eq.s32.totalorder %v2214_v4, %v2225_v6  ;;  %v763_v4 = vunpack.c.l.bf16 %v750_v45 }
 0x113   : > { %1310 = vmatpush1.bf16.msk.msra.mxu0 %vm1309_vm6, %v1802_v61  ;;  %vm907_vm6 = vcmp.eq.s32.totalorder %v2185_v63, %v2225_v6  ;;  %vm1363_vm12 = vmpackc.low %vm912_vm7, %vm910_vm4  ;;  %vm917_vm4 = vcmp.eq.s32.totalorder %v2237_v7, %v2225_v6  ;;  %vm919_vm7 = vcmp.eq.s32.totalorder %v2240_v8, %v2225_v6  ;;  %v752_v63 = vld [vmem:[%s2107_s16 + $0x38] sm:$0xff] }
 0x114   : > { %1312 = vmatprep.subr.msk.bf16.mxu0 %vm1311_vm8, %v1802_v61  ;;  %vm1361_vm8 = vmpackc.low %vm907_vm6, %vm905_vm5  ;;  %vm920_vm5 = vcmp.eq.s32.totalorder %v2240_v8, %v2221_v5 }
 0x115   : > { %vm1365_vm15 = vmpackc.low %vm911_vm11, %vm909_vm10 }
 0x116   : > { %vm1373_vm10 = vmpackc.low %vm919_vm7, %vm917_vm4 }
 0x117   : > { %1314 = vmatpush1.bf16.msk.msra.mxu0 %vm1313_vm13, %v1802_v61  ;;  %vm914_vm13 = vcmp.eq.s32.totalorder %v2211_v3, %v2221_v5 }
 0x118   : > { %vm1367_vm0 = vmpackc.low %vm916_vm14, %vm914_vm13  ;;  %vm923_vm13 = vcmp.eq.s32.totalorder %v2264_v12, %v2225_v6 }
 0x119   : > { %1358 = vmatpush1.bf16.xpose.msk.msra.mxu1 %vm1357_vm3, %v1802_v61  ;;  %vm1369_vm3 = vmpackc.low %vm915_vm1, %vm913_vm2 }
 0x11a   : > { %737 = vmatmul.mubr.bf16.vlgmr.msra.gmra.mrb[0].mxu0 %v703_v13  ;;  %1360 = vmatprep.subr.msk.bf16.mxu1 %vm1359_vm9, %v1802_v61  ;;  %vm918_vm9 = vcmp.eq.s32.totalorder %v2237_v7, %v2221_v5  ;;  %v768_v13 = vunpack.c.h.bf16 %v752_v63 }
 0x11b   : > { %vm1371_vm6 = vmpackc.low %vm920_vm5, %vm918_vm9 }
 0x121   : > { %1362 = vmatpush1.bf16.xpose.msk.msra.mxu1 %vm1361_vm8, %v1802_v61  ;;  %vm922_vm8 = vcmp.eq.s32.totalorder %v2261_v11, %v2221_v5 }
 0x122   : > { %1364 = vmatprep.subr.msk.bf16.mxu1 %vm1363_vm12, %v1802_v61  ;;  %vm924_vm12 = vcmp.eq.s32.totalorder %v2264_v12, %v2221_v5  ;;  %v766_v5 = vunpack.c.h.bf16 %v751_v55  ;;  %v765_v12 = vunpack.c.l.bf16 %v751_v55 }
 0x123   : > { %vm1375_vm11 = vmpackc.low %vm924_vm12, %vm922_vm8 }
 0x129   : > { %1366 = vmatpush1.bf16.xpose.msk.msra.mxu1 %vm1365_vm15, %v1802_v61  ;;  %vm921_vm15 = vcmp.eq.s32.totalorder %v2261_v11, %v2225_v6 }
 0x12a   : > { %1368 = vmatprep.subr.msk.bf16.mxu1 %vm1367_vm0, %v1802_v61  ;;  %vm1377_vm14 = vmpackc.low %vm923_vm13, %vm921_vm15 }
 0x131   : > { %1370 = vmatpush1.bf16.xpose.msk.msra.mxu1 %vm1369_vm3, %v1802_v61 }
 0x132   : > { %1372 = vmatprep.subr.msk.bf16.mxu1 %vm1371_vm6, %v1802_v61 }
 0x139   : > { %1374 = vmatpush1.bf16.xpose.msk.msra.mxu1 %vm1373_vm10, %v1802_v61 }
 0x13a   : > { %1376 = vmatprep.subr.msk.bf16.mxu1 %vm1375_vm11, %v1802_v61 }
 0x141   : > { %1378 = vmatpush1.bf16.xpose.msk.msra.mxu1 %vm1377_vm14, %v1802_v61 }
 0x1ed   : > { %v2371_v16 = vpop.f32.mrb[0].mxu0 }
 0x1ee   : > { %v740_v19 = vpop.f32.mrb[1].mxu0  ;;  %v774_v23 = vrot.slane %v2371_v16, %v2140_v54  ;;  %v786_v35 = vrot.slane %v2371_v16, %v2137_v53  ;;  %v798_v49 = vrot.slane %v2371_v16, %v797_v18  ;;  %v822_v3 = vrot.slane %v2371_v16, %v821_v32 }
 0x1ef   : > { %v742_v24 = vpop.f32.mrb[2].mxu0  ;;  %v778_v27 = vrot.slane %v740_v19, %v2140_v54  ;;  %v790_v28 = vrot.slane %v740_v19, %v2137_v53  ;;  %v802_v39 = vrot.slane %v740_v19, %v797_v18  ;;  %v814_v42 = vrot.slane %v740_v19, %v809_v22 }
 0x1f0   : > { %v743_v29 = vpop.f32.mrb[3].mxu0  ;;  %v779_v48 = vmul.f32 %v774_v23, %v753_v21  ;;  %v826_v53 = vrot.slane %v740_v19, %v821_v32  ;;  %v810_v54 = vrot.slane %v2371_v16, %v809_v22  ;;  %v791_v59 = vmul.f32 %v786_v35, %v755_v30 }
 0x1f1   : > { %v780_v38 = vmul.f32 %v778_v27, %v754_v17  ;;  %v792_v47 = vmul.f32 %v790_v28, %v756_v26  ;;  %v804_v57 = vmul.f32 %v802_v39, %v758_v37  ;;  %v816_v61 = vmul.f32 %v814_v42, %v760_v41 }
 0x1f2   : > { %v781_v58 = vadd.f32 %v779_v48, %v769_v44  ;;  %v838_v62 = vrot.slane %v740_v19, %v833_v33  ;;  %v803_v2 = vmul.f32 %v798_v49, %v757_v40  ;;  %v828_v6 = vmul.f32 %v826_v53, %v762_v52 }
 0x1f3   : > { %v782_v46 = vadd.f32 %v780_v38, %v770_v31  ;;  %v850_v7 = vrot.slane %v740_v19, %v845_v34  ;;  %v815_v10 = vmul.f32 %v810_v54, %v759_v51  ;;  %v834_v11 = vrot.slane %v2371_v16, %v833_v33 }
 0x1f4   : > { %v793_v1 = vadd.f32 %v791_v59, %v781_v58  ;;  %v840_v14 = vmul.f32 %v838_v62, %v764_v50  ;;  %v862_v15 = vrot.slane %v740_v19, %v857_v43  ;;  %v827_v20 = vmul.f32 %v822_v3, %v761_v60 }
 0x1f5   : > { %v794_v56 = vadd.f32 %v792_v47, %v782_v46  ;;  %v846_v21 = vrot.slane %v2371_v16, %v845_v34  ;;  %v767_v22 = vunpack.c.l.bf16 %v752_v63  ;;  %v852_v23 = vmul.f32 %v850_v7, %v766_v5  ;;  %v1005_v34 = vld [vmem:[#allocation12] sm:$0xff] }
 0x1f6   : > { %v805_v9 = vadd.f32 %v803_v2, %v793_v1  ;;  %v839_v26 = vmul.f32 %v834_v11, %v763_v4  ;;  %v858_v27 = vrot.slane %v2371_v16, %v857_v43  ;;  %v864_v29 = vmul.f32 %v862_v15, %v768_v13 }
 0x1f7   : > { %v806_v0 = vadd.f32 %v804_v57, %v794_v56  ;;  %v851_v31 = vmul.f32 %v846_v21, %v765_v12 }
 0x1f8   : > { %v817_v18 = vadd.f32 %v815_v10, %v805_v9  ;;  %v863_v35 = vmul.f32 %v858_v27, %v767_v22 }
 0x1f9   : > { %v818_v8 = vadd.f32 %v816_v61, %v806_v0 }
 0x1fa   : > { %v829_v25 = vadd.f32 %v827_v20, %v817_v18 }
 0x1fb   : > { %v830_v17 = vadd.f32 %v828_v6, %v818_v8 }
 0x1fc   : > { %v841_v30 = vadd.f32 %v839_v26, %v829_v25 }
 0x1fd   : > { %v842_v24 = vadd.f32 %v840_v14, %v830_v17 }
 0x1fe   : > { %v853_v33 = vadd.f32 %v851_v31, %v841_v30 }
 0x1ff   : > { %v854_v28 = vadd.f32 %v852_v23, %v842_v24 }
 0x200   : > { %v865_v36 = vadd.f32 %v863_v35, %v853_v33 }
 0x201   : > { %v866_v32 = vadd.f32 %v864_v29, %v854_v28 }
 0x202   : > { %v1006_v37 = vpack.c.bf16 %v865_v36, %v865_v36 }
 0x203   : > { %v1007_v19 = vpack.c.bf16 %v866_v32, %v866_v32 }
 0x205   : > { %1040 = vmatprep.mubr.bf16.mxu1 %v1007_v19 }
 0x206   : > { %1041 = vmatmul.mubr.bf16.vlgmr.msra.gmra.mrb[0].mxu1 %v1006_v37 }
 0x2d6   : > { %1053 = sbr.rel (%p1379_p9) target bundleno = 752 (0x2f0), region = 84 }
 0x2d9   : > { %v1042_v38 = vpop.f32.mrb[0].mxu1 }
 0x2da   : > { %v1048_v39 = vadd.f32 %v1042_v38, %v1005_v34  ;;  %v1044_v40 = vpop.f32.mrb[1].mxu1 }
 0x2db   : > { %v1045_v41 = vpop.f32.mrb[2].mxu1 }
 0x2dc   : > { %1049 = vst [vmem:[#allocation12] sm:$0xff] %v1048_v39  ;;  %v1046_v42 = vpop.f32.mrb[3].mxu1 }
 0x2e3   : > { %v1054_v16 = vld [vmem:[#allocation12] sm:$0xff] }
 0x2e4   : > { %1516 = vtanh.f32 %v1054_v16 }
 0x2ee   : > { %v1517_v43 = vpop.eup %1516 }
 0x2ef   : > { %1056 = vst [vmem:[#allocation12] sm:$0xff] %v1517_v43 }
 0x2f0 PF: > { %p1455_p10 = scmp.eq.s32.totalorder %s1878_s11, 1  ;;  %s1803_s17 = smov [#allocation12]  }
 0x2f1   : > { %s1066_s12 = sshll.u32 %s1803_s17, 4  ;;  %s1067_s12 = int_to_ptr.vmem [resolvable:$true] %s1066_s12 }
 0x2f2   : > { %s1692_s27 = scalar_lea.vmem %s1067_s12, 128  ;;  %p1699_p13 = scmp.lt.s32.totalorder %s1067_s12, %s1067_s12 }
 0x2f3   : > { %p1693_p6 = scmp.ne.s32.totalorder %s1067_s12, %s1692_s27  ;;  %p1700_p1 = scmp.lt.s32.totalorder %s1692_s27, %s1692_s27 }
 0x2f5   : > { %p1694_p8 = pnand %p1693_p6, %p1455_p10  ;;  %p1701_p4 = por %p1700_p1, %p1699_p13 }
 0x2f7   : > { %p1695_p3 = pneg %p1694_p8 }
 0x2f9   : > { %p1702_p2 = pnand %p1701_p4, %p1695_p3 }
 0x2fb   : > { %1705 = shalt.err (!%p1702_p2)
}
 0x2fc   : > { %s2499_s1 = sld [smem:[#allocation26_spill]] }
 0x302   : > { %s1706_s25 = scalar_lea.hbm %s2499_s1, 128 }
 0x303   : > { %p1707_p5 = scmp.ne.s32.totalorder %s2499_s1, %s1706_s25  ;;  %p1712_p0 = scmp.lt.u32.totalorder %s1706_s25, %s2499_s1 }
 0x305   : > { %p1708_p11 = pnand %p1707_p5, %p1455_p10 }
 0x307   : > { %p1709_p12 = pneg %p1708_p11 }
 0x309   : > { %p1714_p7 = pnand %p1712_p0, %p1709_p12 }
 0x30b   : > { %1717 = shalt.err (!%p1714_p7)
}
 0x30c   : > { %1425 = dma.vmem_to_hbm [thread:$0]  (%p1455_p10), %s1067_s12, 128, %s2499_s1, [#allocation4]  }
 0x30d   : > { %1763 = dma.done.wait (%p1455_p10), [#allocation4], 128  }
 0x30e   : > { %1765 = vsyncadd (%p1455_p10), [#allocation4], 4294967168 }
 0x30f PF: > { %s24_s10 = sadd.s32 1, %s1788_s10   ;;  %s2500_s6 = sld [smem:[#allocation19_spill]] }
 0x310   : > { %p21_p9 = scmp.ge.s32.totalorder %s24_s10, 4   ;;  %s2501_s29 = sld [smem:[#allocation21_spill]] }
 0x311   : > { %s2502_s5 = sld [smem:[#allocation20_spill]]  ;;  %s2503_s27 = smov %s1772_s28 }
 0x312   : > { %s2505_s30 = smov %s1784_s9  ;;  %23 = sbr.rel (!%p21_p9) target bundleno = 13 (0xd), region = 141 }
 0x315   : > { %s2504_s28 = smov %s2500_s6 }
 0x317   : > { %s2506_s9 = smov %s2502_s5 }
 0x319   :  { %1079 = vsyncpa [#allocation3], 1 }
 0x31a   :  { %1081 = vsyncpa [#allocation3 + $0x1], 1 }
 0x31b   :  { %1082 = vsyncpa [#allocation6], 1 }
 0x31c   :  { %1083 = vsyncpa [#allocation10], 1 }
 0x31d   :  { %1085 = vsyncpa [#allocation10 + $0x1], 1 }
 0x31e   :  { %1086 = vsyncpa [#allocation4], 1 }
 0x31f   :  { %1088 = vsyncpa [#allocation4 + $0x1], 1 }

</bundles_post_ra>
